<compile_context>
chip_gen: v6e
topology: v6e:2x2x1
jax: 0.10.0
libtpu: 0.0.40
codegen_flags: <defaults>
</compile_context>

<pallas_src>
import jax
import jax.numpy as jnp
from jax.experimental import pallas as pl
from jax.experimental.pallas import tpu as pltpu

BN_EPS = 1e-5


def mlp_kernel(x_ref, w1_ref, gamma_ref, beta_ref, w2_ref, b2_ref, o_ref, acc_ref):
    k = pl.program_id(1)

    @pl.when(k == 0)
    def _init():
        acc_ref[...] = jnp.zeros_like(acc_ref)

    # Linear 1 (no bias) on this hidden slice: (B, D_in) @ (D_in, tH) -> (B, tH)
    h = jnp.dot(x_ref[...], w1_ref[...], preferred_element_type=jnp.float32)

    # BatchNorm1d (training mode): per-feature stats over the FULL batch axis,
    # so the H-tiling is numerically exact.  One pass (sum + sum-of-squares),
    # fused scale / shift, all elementwise math in f32 (v5e-friendly).
    inv_b = 1.0 / h.shape[0]
    mean = jnp.sum(h, axis=0, keepdims=True) * inv_b           # (1, tH)
    mean_sq = jnp.sum(h * h, axis=0, keepdims=True) * inv_b    # (1, tH)
    var = jnp.maximum(mean_sq - mean * mean, 0.0)              # clamp: no NaN risk
    inv_std = jax.lax.rsqrt(var + BN_EPS)
    scale = gamma_ref[...] * inv_std
    shift = beta_ref[...] - mean * scale

    # BN + ReLU
    h = jnp.maximum(h * scale + shift, 0.0)

    # Linear 2 partial product over this hidden slice, accumulated in f32 scratch
    acc_ref[...] += jnp.dot(
        h.astype(w2_ref.dtype), w2_ref[...], preferred_element_type=jnp.float32
    )

    @pl.when(k == pl.num_programs(1) - 1)
    def _finalize():
        o_ref[...] = (acc_ref[...] + b2_ref[...]).astype(o_ref.dtype)


def _vmem_capacity_bytes():
    try:
        return int(pltpu.get_tpu_info().vmem_capacity_bytes)
    except Exception:
        return 64 * 2**20   # conservative fallback (v7x physical VMEM)


def _num_tensorcores():
    # v7x exposes 2 TensorCores per chip (split via CORE_PARALLEL); v5e/v6e have 1.
    try:
        kind = jax.devices()[0].device_kind.lower()
    except Exception:
        return 1
    return 2 if "v7" in kind else 1


def _pick_tile_h(H, requested, fits):
    """Largest divisor of H that is a multiple of 128 (or H itself), <= requested,
    whose VMEM footprint fits the budget."""
    requested = max(1, min(int(requested), H))
    cands = [t for t in range(requested, 0, -1)
             if H % t == 0 and (t % 128 == 0 or t == H)]
    if not cands:
        cands = [H]
    for t in cands:
        if fits(t):
            return t
    return cands[-1]


def mlp_forward(x, w1, gamma, beta, w2, b2, *, tile_h=2048, core_split=None,
                use_bf16_matmul=True):
    B, D_in = x.shape
    H = w1.shape[1]
    D_out = w2.shape[1]
    assert w1.shape[0] == D_in and w2.shape[0] == H
    assert gamma.size == H and beta.size == H and b2.size == D_out

    # --- optional dual-TensorCore split of the output columns (v7x) ----------
    if core_split is None:
        core_split = _num_tensorcores()
    split = 2 if (int(core_split) == 2 and D_out % 256 == 0) else 1
    out_tile = D_out // split

    compute_dtype = jnp.bfloat16 if use_bf16_matmul else jnp.float32
    isz = jnp.dtype(compute_dtype).itemsize

    # --- generation-aware VMEM budget ----------------------------------------
    vmem_cap = int(0.75 * _vmem_capacity_bytes())   # ~48 MiB v7x, ~96 MiB v5e/v6e

    def block_bytes(th):
        return (
            B * D_in * isz               # x (single-buffered via pl.Buffered(1))
            + 2 * D_in * th * isz        # w1 slice (double-buffered)
            + 2 * 2 * th * 4             # gamma + beta (f32, double-buffered)
            + 2 * th * out_tile * isz    # w2 slice (double-buffered)
            + 2 * out_tile * 4           # b2 (f32)
            + 2 * B * out_tile * 4       # f32 output block (double-buffered)
            + B * out_tile * 4           # f32 accumulator scratch
            + B * th * 4                 # f32 hidden intermediate (GEMM1 output)
            + B * th * isz               # bf16 cast copy of hidden for GEMM2
        )

    tile_h = _pick_tile_h(
        H, tile_h, lambda th: int(1.25 * block_bytes(th)) <= vmem_cap)
    n_k = H // tile_h
    vmem_limit = int(min(vmem_cap,
                         max(32 * 2**20, int(1.25 * block_bytes(tile_h)))))

    # --- cast operands; f32 accumulation / BN math stay inside the kernel ----
    x_c = x.astype(compute_dtype)
    w1_c = w1.astype(compute_dtype)
    w2_c = w2.astype(compute_dtype)
    gamma_c = gamma.reshape(1, H).astype(jnp.float32)
    beta_c = beta.reshape(1, H).astype(jnp.float32)
    b2_c = b2.reshape(1, D_out).astype(jnp.float32)

    # --- advisory cost estimate for the XLA scheduler -------------------------
    flops = (split * 2 * B * D_in * H      # GEMM1 (redone per core half if split)
             + 2 * B * H * D_out           # GEMM2
             + split * 8 * B * H)          # BN + ReLU elementwise
    bytes_accessed = (
        B * D_in * isz
        + split * D_in * H * isz           # w1 streamed once per core
        + H * D_out * isz
        + 2 * H * 4 + D_out * 4
        + B * D_out * 4
    )
    cost = pl.CostEstimate(
        flops=int(flops),
        transcendentals=int(split * H),    # rsqrt per feature
        bytes_accessed=int(bytes_accessed),
    )

    grid = (split, n_k)
    core_sem = pltpu.CORE_PARALLEL if split == 2 else pltpu.ARBITRARY
    grid_spec = pltpu.PrefetchScalarGridSpec(
        num_scalar_prefetch=0,
        grid=grid,
        in_specs=[
            # x: constant block -> fetched once, single buffer.
            pl.BlockSpec((B, D_in), lambda j, k: (0, 0),
                         pipeline_mode=pl.Buffered(1)),
            pl.BlockSpec((D_in, tile_h), lambda j, k: (0, k)),     # w1 hidden slice
            pl.BlockSpec((1, tile_h), lambda j, k: (0, k)),        # gamma slice
            pl.BlockSpec((1, tile_h), lambda j, k: (0, k)),        # beta slice
            pl.BlockSpec((tile_h, out_tile), lambda j, k: (k, j)), # w2 slice
            pl.BlockSpec((1, out_tile), lambda j, k: (0, j)),      # b2 slice
        ],
        out_specs=pl.BlockSpec((B, out_tile), lambda j, k: (0, j)),  # resident over k
        scratch_shapes=[pltpu.VMEM((B, out_tile), jnp.float32)],
    )

    return pl.pallas_call(
        mlp_kernel,
        out_shape=jax.ShapeDtypeStruct((B, D_out), jnp.float32),
        grid_spec=grid_spec,
        compiler_params=pltpu.CompilerParams(
            dimension_semantics=(core_sem, pltpu.ARBITRARY),
            vmem_limit_bytes=vmem_limit,
        ),
        cost_estimate=cost,
    )(x_c, w1_c, gamma_c, beta_c, w2_c, b2_c)


def init_params(key, input_dim, hidden_size, output_dim):
    """Deterministic init mimicking PyTorch defaults (uniform linears, BN gamma=1/beta=0)."""
    k1, k2, k3 = jax.random.split(key, 3)
    bound1 = 1.0 / jnp.sqrt(input_dim)
    w1 = jax.random.uniform(
        k1, (input_dim, hidden_size), jnp.float32, -bound1, bound1)
    gamma = jnp.ones((1, hidden_size), jnp.float32)
    beta = jnp.zeros((1, hidden_size), jnp.float32)
    bound2 = 1.0 / jnp.sqrt(hidden_size)
    w2 = jax.random.uniform(
        k2, (hidden_size, output_dim), jnp.float32, -bound2, bound2)
    b2 = jax.random.uniform(k3, (1, output_dim), jnp.float32, -bound2, bound2)
    return w1, gamma, beta, w2, b2


def reference_forward(x, w1, gamma, beta, w2, b2):
    """Pure f32 JAX reference matching PyTorch Linear->BN1d(train)->ReLU->Linear."""
    h = x @ w1
    mean = h.mean(axis=0, keepdims=True)
    var = ((h - mean) ** 2).mean(axis=0, keepdims=True)
    h = (h - mean) / jnp.sqrt(var + BN_EPS) * gamma + beta
    h = jnp.maximum(h, 0.0)
    return h @ w2 + b2


if __name__ == "__main__":
    # Small, lane-dense correctness shapes (NOT a perf configuration — perf runs
    # should use B >= 128/256 and the real 2048/4096/256 SimSiam dims).
    batch, input_dim, hidden_size, output_dim = 32, 128, 256, 256

    key = jax.random.PRNGKey(0)
    kx, kp = jax.random.split(key)
    x = jax.random.normal(kx, (batch, input_dim), jnp.float32)
    w1, gamma, beta, w2, b2 = init_params(kp, input_dim, hidden_size, output_dim)

    # tile_h=128 forces a 2-step hidden reduction so the accumulator path
    # (init / accumulate / finalize) is exercised even at these tiny shapes.
    out = mlp_forward(x, w1, gamma, beta, w2, b2, tile_h=128)
    out = jax.block_until_ready(out)

    ref = reference_forward(x, w1, gamma, beta, w2, b2)
    assert out.shape == (batch, output_dim)
    assert out.dtype == jnp.float32
    max_err = float(jnp.max(jnp.abs(out - ref)))
    # Relaxed tolerance: MXU operands are bf16 (f32 accumulation), reference is f32.
    assert jnp.allclose(out, ref, atol=2e-2, rtol=2e-2), (
        f"mismatch vs reference (max abs err {max_err:.3e})"
    )

    print("KERNEL_OK")
</pallas_src>

<mosaic_0001>
module attributes {stable_mosaic.version = 11 : i64} {
  func.func @mlp_kernel(%arg0: i32, %arg1: i32, %arg2: memref<32x128xbf16, #tpu.memory_space<vmem>>, %arg3: memref<128x128xbf16, #tpu.memory_space<vmem>>, %arg4: memref<1x128xf32, #tpu.memory_space<vmem>>, %arg5: memref<1x128xf32, #tpu.memory_space<vmem>>, %arg6: memref<128x256xbf16, #tpu.memory_space<vmem>>, %arg7: memref<1x256xf32, #tpu.memory_space<vmem>>, %arg8: memref<32x256xf32, #tpu.memory_space<vmem>>, %arg9: memref<32x256xf32, #tpu.memory_space<vmem>>) attributes {dimension_semantics = [#tpu.dimension_semantics<arbitrary>, #tpu.dimension_semantics<arbitrary>], iteration_bounds = array<i64: 1, 2>, scalar_prefetch = 0 : i64, scratch_operands = 1 : i64, tpu.core_type = #tpu.core_type<tc>, window_params = [{pipeline_mode = #tpu.pipeline_mode<synchronous>, transform_indices = @transform_0, window_bounds = array<i64: 32, 128>}, {transform_indices = @transform_1, window_bounds = array<i64: 128, 128>}, {transform_indices = @transform_2, window_bounds = array<i64: 1, 128>}, {transform_indices = @transform_3, window_bounds = array<i64: 1, 128>}, {transform_indices = @transform_4, window_bounds = array<i64: 128, 256>}, {transform_indices = @transform_5, window_bounds = array<i64: 1, 256>}, {transform_indices = @transform_6, window_bounds = array<i64: 32, 256>}]} {
    %c0_i32 = arith.constant 0 : i32
    %0 = arith.cmpi eq, %arg1, %c0_i32 : i32
    %1 = arith.extui %0 : i1 to i32
    %c0_i32_0 = arith.constant 0 : i32
    %2 = arith.cmpi ne, %1, %c0_i32_0 : i32
    scf.if %2 {
      %cst_23 = arith.constant 0.000000e+00 : f32
      %42 = vector.broadcast %cst_23 : f32 to vector<32x256xf32>
      %c0_24 = arith.constant 0 : index
      %c0_25 = arith.constant 0 : index
      %43 = vector.load %arg9[%c0_24, %c0_25] : memref<32x256xf32, #tpu.memory_space<vmem>>, vector<32x256xf32>
      tpu.vector_store %arg9[%c0_24, %c0_25], %42 {strides = array<i32>} : memref<32x256xf32, #tpu.memory_space<vmem>>, vector<32x256xf32>,
    } else {
    }
    %c0 = arith.constant 0 : index
    %c0_1 = arith.constant 0 : index
    %3 = vector.load %arg2[%c0, %c0_1] : memref<32x128xbf16, #tpu.memory_space<vmem>>, vector<32x128xbf16>
    %c0_2 = arith.constant 0 : index
    %c0_3 = arith.constant 0 : index
    %4 = vector.load %arg3[%c0_2, %c0_3] : memref<128x128xbf16, #tpu.memory_space<vmem>>, vector<128x128xbf16>
    %cst = arith.constant dense<0.000000e+00> : vector<32x128xf32>
    %5 = tpu.matmul %3, %4, %cst {dimension_numbers = #tpu.dot_dimension_numbers<[1], [0], [0], [1], [0, 0, 1, 1], [], []>} : vector<32x128xbf16>, vector<128x128xbf16>, vector<32x128xf32> -> vector<32x128xf32>
    %cst_4 = arith.constant dense<0.000000e+00> : vector<128xf32>
    %6 = vector.multi_reduction <add>, %5, %cst_4 [0] : vector<32x128xf32> to vector<128xf32>
    %7 = vector.shape_cast %6 : vector<128xf32> to vector<1x128xf32>
    %cst_5 = arith.constant 3.125000e-02 : f32
    %8 = vector.broadcast %cst_5 : f32 to vector<1x128xf32>
    %9 = arith.mulf %7, %8 : vector<1x128xf32>
    %10 = arith.mulf %5, %5 : vector<32x128xf32>
    %cst_6 = arith.constant dense<0.000000e+00> : vector<128xf32>
    %11 = vector.multi_reduction <add>, %10, %cst_6 [0] : vector<32x128xf32> to vector<128xf32>
    %12 = vector.shape_cast %11 : vector<128xf32> to vector<1x128xf32>
    %cst_7 = arith.constant 3.125000e-02 : f32
    %13 = vector.broadcast %cst_7 : f32 to vector<1x128xf32>
    %14 = arith.mulf %12, %13 : vector<1x128xf32>
    %15 = arith.mulf %9, %9 : vector<1x128xf32>
    %16 = arith.subf %14, %15 : vector<1x128xf32>
    %cst_8 = arith.constant 0.000000e+00 : f32
    %17 = vector.broadcast %cst_8 : f32 to vector<1x128xf32>
    %18 = arith.maximumf %16, %17 : vector<1x128xf32>
    %cst_9 = arith.constant 9.99999974E-6 : f32
    %19 = vector.broadcast %cst_9 : f32 to vector<1x128xf32>
    %20 = arith.addf %18, %19 : vector<1x128xf32>
    %21 = math.rsqrt %20 : vector<1x128xf32>
    %c0_10 = arith.constant 0 : index
    %c0_11 = arith.constant 0 : index
    %22 = vector.load %arg4[%c0_10, %c0_11] : memref<1x128xf32, #tpu.memory_space<vmem>>, vector<1x128xf32>
    %23 = arith.mulf %22, %21 : vector<1x128xf32>
    %c0_12 = arith.constant 0 : index
    %c0_13 = arith.constant 0 : index
    %24 = vector.load %arg5[%c0_12, %c0_13] : memref<1x128xf32, #tpu.memory_space<vmem>>, vector<1x128xf32>
    %25 = arith.mulf %9, %23 : vector<1x128xf32>
    %26 = arith.subf %24, %25 : vector<1x128xf32>
    %27 = vector.broadcast %23 : vector<1x128xf32> to vector<32x128xf32>
    %28 = arith.mulf %5, %27 : vector<32x128xf32>
    %29 = vector.broadcast %26 : vector<1x128xf32> to vector<32x128xf32>
    %30 = arith.addf %28, %29 : vector<32x128xf32>
    %cst_14 = arith.constant 0.000000e+00 : f32
    %31 = vector.broadcast %cst_14 : f32 to vector<32x128xf32>
    %32 = arith.maximumf %30, %31 : vector<32x128xf32>
    %c0_15 = arith.constant 0 : index
    %c0_16 = arith.constant 0 : index
    %33 = vector.load %arg9[%c0_15, %c0_16] : memref<32x256xf32, #tpu.memory_space<vmem>>, vector<32x256xf32>
    %34 = arith.truncf %32 : vector<32x128xf32> to vector<32x128xbf16>
    %c0_17 = arith.constant 0 : index
    %c0_18 = arith.constant 0 : index
    %35 = vector.load %arg6[%c0_17, %c0_18] : memref<128x256xbf16, #tpu.memory_space<vmem>>, vector<128x256xbf16>
    %cst_19 = arith.constant dense<0.000000e+00> : vector<32x256xf32>
    %36 = tpu.matmul %34, %35, %cst_19 {dimension_numbers = #tpu.dot_dimension_numbers<[1], [0], [0], [1], [0, 0, 1, 1], [], []>} : vector<32x128xbf16>, vector<128x256xbf16>, vector<32x256xf32> -> vector<32x256xf32>
    %37 = arith.addf %33, %36 : vector<32x256xf32>
    %c0_20 = arith.constant 0 : index
    %c0_21 = arith.constant 0 : index
    %38 = vector.load %arg9[%c0_20, %c0_21] : memref<32x256xf32, #tpu.memory_space<vmem>>, vector<32x256xf32>
    tpu.vector_store %arg9[%c0_20, %c0_21], %37 {strides = array<i32>} : memref<32x256xf32, #tpu.memory_space<vmem>>, vector<32x256xf32>,
    %c1_i32 = arith.constant 1 : i32
    %39 = arith.cmpi eq, %arg1, %c1_i32 : i32
    %40 = arith.extui %39 : i1 to i32
    %c0_i32_22 = arith.constant 0 : i32
    %41 = arith.cmpi ne, %40, %c0_i32_22 : i32
    scf.if %41 {
      %c0_23 = arith.constant 0 : index
      %c0_24 = arith.constant 0 : index
      %42 = vector.load %arg9[%c0_23, %c0_24] : memref<32x256xf32, #tpu.memory_space<vmem>>, vector<32x256xf32>
      %c0_25 = arith.constant 0 : index
      %c0_26 = arith.constant 0 : index
      %43 = vector.load %arg7[%c0_25, %c0_26] : memref<1x256xf32, #tpu.memory_space<vmem>>, vector<1x256xf32>
      %44 = vector.broadcast %43 : vector<1x256xf32> to vector<32x256xf32>
      %45 = arith.addf %42, %44 : vector<32x256xf32>
      %c0_27 = arith.constant 0 : index
      %c0_28 = arith.constant 0 : index
      %46 = vector.load %arg8[%c0_27, %c0_28] : memref<32x256xf32, #tpu.memory_space<vmem>>, vector<32x256xf32>
      tpu.vector_store %arg8[%c0_27, %c0_28], %45 {strides = array<i32>} : memref<32x256xf32, #tpu.memory_space<vmem>>, vector<32x256xf32>,
    } else {
    }
    return
  }
  func.func @transform_0(%arg0: i32, %arg1: i32) -> (i32, i32) {
    %c0_i32 = arith.constant 0 : i32
    %c0_i32_0 = arith.constant 0 : i32
    %c0_i32_1 = arith.constant 0 : i32
    return %c0_i32, %c0_i32_0 : i32, i32
  }
  func.func @transform_1(%arg0: i32, %arg1: i32) -> (i32, i32) {
    %c0_i32 = arith.constant 0 : i32
    %c0_i32_0 = arith.constant 0 : i32
    return %c0_i32, %arg1 : i32, i32
  }
  func.func @transform_2(%arg0: i32, %arg1: i32) -> (i32, i32) {
    %c0_i32 = arith.constant 0 : i32
    %c0_i32_0 = arith.constant 0 : i32
    return %c0_i32, %arg1 : i32, i32
  }
  func.func @transform_3(%arg0: i32, %arg1: i32) -> (i32, i32) {
    %c0_i32 = arith.constant 0 : i32
    %c0_i32_0 = arith.constant 0 : i32
    return %c0_i32, %arg1 : i32, i32
  }
  func.func @transform_4(%arg0: i32, %arg1: i32) -> (i32, i32) {
    %c0_i32 = arith.constant 0 : i32
    return %arg1, %arg0 : i32, i32
  }
  func.func @transform_5(%arg0: i32, %arg1: i32) -> (i32, i32) {
    %c0_i32 = arith.constant 0 : i32
    %c0_i32_0 = arith.constant 0 : i32
    return %c0_i32, %arg0 : i32, i32
  }
  func.func @transform_6(%arg0: i32, %arg1: i32) -> (i32, i32) {
    %c0_i32 = arith.constant 0 : i32
    %c0_i32_0 = arith.constant 0 : i32
    return %c0_i32, %arg0 : i32, i32
  }
}

</mosaic_0001>

<bundles_post_ra>
// kernel: tpu_custom_call.1
= control target key start
LH: loop header
LB: loop body
LE: loop exit
PB: predicated region body
PF: predicated region fallthrough
CT: control target
= control target key end

     0   :  { %11 = vsyncpa [#allocation4], 0  ;;  %s1579_s0 = inlined_call_operand.hbm [shape: bf16[32,128], index: 0, kind: input, shape index: {}]   ;;  %s1580_s1 = inlined_call_operand.hbm [shape: bf16[128,256], index: 1, kind: input, shape index: {}]   ;;  %s1581_s2 = inlined_call_operand.vmem [shape: f32[1,256], index: 2, kind: input, shape index: {}]   ;;  %s1582_s3 = inlined_call_operand.vmem [shape: f32[1,256], index: 3, kind: input, shape index: {}]   ;;  %s1583_s4 = inlined_call_operand.hbm [shape: bf16[256,256], index: 4, kind: input, shape index: {}]   ;;  %s1584_s5 = inlined_call_operand.vmem [shape: f32[1,256], index: 5, kind: input, shape index: {}]   ;;  %s1585_s6 = inlined_call_operand.hbm [shape: f32[32,256], index: 6, kind: output, shape index: {}]  }
   0x1   :  { %12 = vsyncpa [#allocation7], 0 }
   0x2   :  { %14 = vsyncpa [#allocation7 + $0x1], 0 }
   0x3   :  { %15 = vsyncpa [#allocation5], 0  ;;  %s1348_s21 = smov 0   ;;  %s1350_s22 = smov 0  }
   0x4   :  { %s1352_s23 = smov 0   ;;  %s1354_s24 = smov 0  }
   0x5   :  { %s1356_s25 = smov 0   ;;  %s1358_s26 = smov 0  }
   0x6 LB: > { %s30_s27 = sadd.s32 1, %s1295_s25  ;;  %s61_s28 = sadd.s32 1, %s1287_s23  ;;  %s1299_s26 = sphi %s1358_s26, %s21_s26   ;;  %s1295_s25 = sphi %s1356_s25, %s1600_s25   ;;  %s1291_s24 = sphi %s1354_s24, %s1599_s24   ;;  %s1287_s23 = sphi %s1352_s23, %s1598_s23   ;;  %s1283_s22 = sphi %s1350_s22, %s1597_s22   ;;  %s1279_s21 = sphi %s1348_s21, %s1596_s21  }
   0x7   : > { %p31_p0 = scmp.ge.s32.totalorder %s30_s27, 2  ;;  %p68_p1 = scmp.ne.s32.totalorder %s1287_s23, %s1283_s22 }
   0x8   : > { %p69_p2 = scmp.eq.s32.totalorder %s1299_s26, 0  ;;  %p1037_p5 = scmp.lt.s32.totalorder %s1299_s26, 2 }
   0x9   : > { %s1602_s27 = smov (%p31_p0, %s30_s27), 0  ;;  %s251_s7 = sand.u32 1, %s1299_s26  }
   0xa   : > { %p1385_p3 = por %p69_p2, %p68_p1  ;;  %s58_s30 = ssub.s32 %s1295_s25, %s1602_s27 }
   0xb   : > { %p59_p4 = scmp.eq.s32.totalorder %s58_s30, 0  ;;  %s253_s8 = sand.u32 1, %s1287_s23  }
   0xc   : > { %s939_s10 = sshll.u32 %s253_s8, 6  ;;  %s940_s11 = sshll.u32 %s1295_s25, 6 }
   0xd   : > { %s1395_s9 = scalar_select %p59_p4, %s1287_s23, %s61_s28  }
   0xe   : > { %s260_s14 = scalar_lea.hbm %s1580_s1, %s940_s11  ;;  %s255_s15 = scalar_lea.vmem [#allocation6], %s939_s10 }
   0xf   : > { %s261_s16 = sshll.u32 %s255_s15, 4  ;;  %p1405_p6 = pnand %p1037_p5, %p1385_p3  ;;  %s262_s16 = int_to_ptr.vmem [resolvable:$true] %s261_s16 }
  0x10   : > { %s1409_s18 = scalar_lea.sflag [#allocation7], %s251_s7  ;;  %s1148_s19 = scalar_lea.vmem %s262_s16, 1024 }
  0x11   : > { %p1588_p7 = pneg %p1405_p6  ;;  %p1149_p8 = scmp.ne.s32.totalorder %s262_s16, %s1148_s19 }
  0x12   : > { %s1301_s20 = smov [#allocation6]  }
  0x13   : > { %p1151_p9 = pnand %p1149_p8, %p1588_p7  ;;  %s1153_s28 = sshll.u32 %s1301_s20, 4  ;;  %s1154_s28 = int_to_ptr.vmem [resolvable:$false] %s1153_s28 }
  0x14   : > { %s1155_s29 = scalar_lea.vmem %s1154_s28, 2048  ;;  %p1156_p11 = scmp.lt.s32.totalorder %s262_s16, %s1154_s28 }
  0x15   : > { %p1152_p10 = pneg %p1151_p9  ;;  %p1157_p12 = scmp.lt.s32.totalorder %s1155_s29, %s1148_s19 }
  0x17   : > { %p1158_p13 = por %p1157_p12, %p1156_p11 }
  0x19   : > { %p1159_p0 = pnand %p1158_p13, %p1152_p10 }
  0x1b   : > { %1162 = shalt.err (!%p1159_p0)
}
  0x1c   : > { %s1586_s30 = smov 128   ;;  %s1587_s7 = smov 64  }
  0x1d   : > { %s1304_s10 = smov 4   ;;  %s1423_s11 = sadd.s32 4294967295, %s1299_s26  }
  0x1e   : > { %1032 = dma.hbm_to_vmem [thread:$0]  (!%p1405_p6), %s260_s14, 1024, %s262_s16, %s1409_s18, %s1586_s30, %s1587_s7, %s1304_s10  }
  0x1f   : > { %p74_p1 = scmp.ne.s32.totalorder %s1283_s22, %s1279_s21  ;;  %p75_p2 = scmp.eq.s32.totalorder %s1423_s11, 0 }
  0x20   : > { %p935_p3 = scmp.ge.s32.totalorder %s1299_s26, 1  ;;  %p217_p4 = scmp.lt.s32.totalorder %s1299_s26, 3 }
  0x21   : > { %p1432_p5 = por %p75_p2, %p74_p1  ;;  %s1305_s14 = smov [#allocation3]  }
  0x22   : > { %p1436_p8 = pnand %p935_p3, %p217_p4  ;;  %s229_s15 = sshll.u32 %s1305_s14, 4  ;;  %s230_s15 = int_to_ptr.vmem [resolvable:$true] %s229_s15 }
  0x23   : > { %s941_s16 = sshll.u32 %s253_s8, 7  ;;  %s982_s21 = sshll.u32 %s1295_s25, 11 }
  0x24   : > { %p1025_p9 = pneg %p1436_p8  ;;  %s287_s19 = scalar_lea.vmem [#allocation8], %s941_s16 }
  0x25   : > { %s297_s20 = sshll.u32 %s287_s19, 4  ;;  %s1450_s30 = scalar_lea.hbm %s1583_s4, %s982_s21  ;;  %s1452_s20 = int_to_ptr.vmem [resolvable:$true] %s297_s20 }
  0x26   : > { %p1026_p10 = pnand %p1025_p9, %p75_p2  ;;  %s1174_s7 = scalar_lea.vmem %s230_s15, 256 }
  0x27   : > { %p1175_p12 = scmp.ne.s32.totalorder %s230_s15, %s1174_s7  ;;  %p1182_p1 = scmp.lt.s32.totalorder %s230_s15, %s230_s15 }
  0x28   : > { %p1165_p11 = pneg %p1026_p10  ;;  %p1183_p3 = scmp.lt.s32.totalorder %s1174_s7, %s1174_s7 }
  0x2a   : > { %p1177_p13 = pnand %p1175_p12, %p1165_p11  ;;  %p1184_p4 = por %p1183_p3, %p1182_p1 }
  0x2c   : > { %p1178_p0 = pneg %p1177_p13 }
  0x2e   : > { %p1185_p7 = pnand %p1184_p4, %p1178_p0 }
  0x30   : > { %1188 = shalt.err (!%p1185_p7)
}
  0x31   : > { %s1593_s8 = smov 64   ;;  %s1202_s21 = scalar_lea.vmem %s1452_s20, 2048 }
  0x32   : > { %1028 = dma.hbm_to_vmem [thread:$0]  (!%p1026_p10), %s1579_s0, 256, %s230_s15, [#allocation4], %s1593_s8, %s1593_s8, %s1304_s10  }
  0x33   : > { %p1203_p9 = scmp.ne.s32.totalorder %s1452_s20, %s1202_s21  ;;  %p1594_p11 = pneg %p1405_p6 }
  0x34   : > { %s1306_s7 = smov [#allocation8]  }
  0x35   : > { %p1205_p12 = pnand %p1203_p9, %p1594_p11  ;;  %s1207_s19 = sshll.u32 %s1306_s7, 4  ;;  %s1208_s19 = int_to_ptr.vmem [resolvable:$false] %s1207_s19 }
  0x36   : > { %s1209_s28 = scalar_lea.vmem %s1208_s19, 4096  ;;  %p1210_p7 = scmp.lt.s32.totalorder %s1452_s20, %s1208_s19 }
  0x37   : > { %p1206_p13 = pneg %p1205_p12  ;;  %p1211_p0 = scmp.lt.s32.totalorder %s1209_s28, %s1202_s21 }
  0x39   : > { %p1212_p1 = por %p1211_p0, %p1210_p7 }
  0x3b   : > { %p1213_p3 = pnand %p1212_p1, %p1206_p13 }
  0x3d   : > { %1216 = shalt.err (!%p1213_p3)
}
  0x3e   : > { %s1307_s29 = smov 8   ;;  %s1595_s14 = smov 128  }
  0x3f   : > { %1035 = dma.hbm_to_vmem [thread:$0]  (!%p1405_p6), %s1450_s30, 2048, %s1452_s20, %s1409_s18, %s1595_s14, %s1595_s14, %s1307_s29  }
  0x40   : > { %309 = sbr.rel (%p1436_p8) target bundleno = 611 (0x263), region = 44 }
  0x45   : > { %1266 = dma.done.wait (%p75_p2), [#allocation4], 256  }
  0x46   : > { %1268 = vsyncadd (%p75_p2), [#allocation4], 4294967040  ;;  %s315_s10 = sand.u32 1, %s1423_s11   ;;  %s317_s17 = sand.u32 1, %s1283_s22  }
  0x47   : > { %s947_s15 = sshll.u32 %s317_s17, 6  ;;  %s316_s8 = scalar_lea.sflag [#allocation7], %s315_s10 }
  0x48   : > { %s1481_s16 = scalar_lea.vmem [#allocation6], %s947_s15 }
  0x49   : > { %1270 = dma.done.wait (%p1432_p5), %s316_s8, 3072  }
  0x4a   : > { %1272 = vsyncadd (%p1432_p5), %s316_s8, 4294964224  ;;  %s948_s18 = sshll.u32 %s317_s17, 7  ;;  %p367_p6 = scmp.lt.s32.totalorder %s1291_s24, 1 }
  0x4b   : > { %s1499_s29 = scalar_lea.vmem [#allocation8], %s948_s18  ;;  %p949_p2 = scmp.ne.s32.totalorder %s1291_s24, 0 }
  0x4c   : > { %s1489_s30 = scalar_select %p367_p6, %s1291_s24, 1 }
  0x4d   : > { %385 = sbr.rel (%p949_p2) target bundleno = 87 (0x57), region = 60 }
  0x4e   : > { %s369_s21 = scalar_lea.vmem %s1581_s2, %s1489_s30  ;;  %s372_s28 = scalar_lea.vmem %s1582_s3, %s1489_s30 }
  0x52   : > { %v1308_v0 = vmov 0.0  }
  0x53   : > { %386 = vst [vmem:[#allocation2 + $0x30] sm:$0xff] %v1308_v0  ;;  %387 = vst [vmem:[#allocation2] sm:$0xff] %v1308_v0 }
  0x54   : > { %388 = vst [vmem:[#allocation2 + $0x18] sm:$0xff] %v1308_v0  ;;  %389 = vst [vmem:[#allocation2 + $0x10] sm:$0xff] %v1308_v0 }
  0x55   : > { %390 = vst [vmem:[#allocation2 + $0x8] sm:$0xff] %v1308_v0  ;;  %391 = vst [vmem:[#allocation2 + $0x20] sm:$0xff] %v1308_v0 }
  0x56   : > { %392 = vst [vmem:[#allocation2 + $0x28] sm:$0xff] %v1308_v0  ;;  %393 = vst [vmem:[#allocation2 + $0x38] sm:$0xff] %v1308_v0 }
  0x57 PF: > { %v1099_v1 = vld [vmem:[%s1481_s16 + $0x38] sm:$0xff]   ;;  %v1100_v2 = vld [vmem:[%s1481_s16 + $0x30] sm:$0xff]   ;;  %v1101_v3 = vld [vmem:[%s1481_s16 + $0x28] sm:$0xff]   ;;  %v1309_v27 = vmov 0   ;;  %v558_v60 = vlaneseq  ;;  %p976_p5 = scmp.ne.s32.totalorder %s1291_s24, 1 }
  0x58   : > { %993 = vmatprep.subr.bf16.mxu0 %v1099_v1  ;;  %v1102_v4 = vld [vmem:[%s1481_s16 + $0x20] sm:$0xff]   ;;  %v1107_v5 = vld [vmem:[#allocation3] sm:$0xff]   ;;  %v1103_v6 = vld [vmem:[%s1481_s16 + $0x18] sm:$0xff]   ;;  %719 = vmatprep.mubr.bf16.mxu1 %v1309_v27 }
  0x59   : > { %994 = vmatpush3.bf16.msra.mxu0 %v1099_v1  ;;  %1009 = vmatprep.mubr.bf16.mxu0 %v1107_v5  ;;  %v1104_v7 = vld [vmem:[%s1481_s16 + $0x10] sm:$0xff]   ;;  %v1105_v8 = vld [vmem:[%s1481_s16 + $0x8] sm:$0xff]   ;;  %v1106_v9 = vld [vmem:[%s1481_s16] sm:$0xff]   ;;  %v1526_v61 = vshrl.u32 %v558_v60, 7 }
  0x5a   : > { %995 = vmatprep.subr.bf16.mxu0 %v1100_v2  ;;  %v1108_v10 = vld [vmem:[#allocation3 + $0x8] sm:$0xff]   ;;  %v1112_v13 = vld [vmem:[%s1499_s29 + $0x64] ss:$8 sps:$4 sm:$0xff]   ;;  %v1114_v14 = vld [vmem:[%s1499_s29 + $0x60] ss:$8 sps:$4 sm:$0xff]  }
  0x5b   : > { %v1109_v11 = vld [vmem:[%s1499_s29 + $0x74] ss:$8 sps:$4 sm:$0xff]   ;;  %v1111_v12 = vld [vmem:[%s1499_s29 + $0x70] ss:$8 sps:$4 sm:$0xff]   ;;  %v1118_v17 = vld [vmem:[%s1499_s29 + $0x44] ss:$8 sps:$4 sm:$0xff]  }
  0x5c   : > { %687 = vmatprep.subr.bf16.mxu1 %v1109_v11  ;;  %v1115_v15 = vld [vmem:[%s1499_s29 + $0x54] ss:$8 sps:$4 sm:$0xff]   ;;  %v1117_v16 = vld [vmem:[%s1499_s29 + $0x50] ss:$8 sps:$4 sm:$0xff]   ;;  %v1120_v18 = vld [vmem:[%s1499_s29 + $0x40] ss:$8 sps:$4 sm:$0xff]  }
  0x5d   : > { %996 = vmatpush3.bf16.msra.mxu0 %v1100_v2  ;;  %688 = vmatpush1.bf16.msra.mxu1 %v1111_v12  ;;  %v1121_v19 = vld [vmem:[%s1499_s29 + $0x34] ss:$8 sps:$4 sm:$0xff]   ;;  %v1123_v20 = vld [vmem:[%s1499_s29 + $0x30] ss:$8 sps:$4 sm:$0xff]   ;;  %v1124_v21 = vld [vmem:[%s1499_s29 + $0x24] ss:$8 sps:$4 sm:$0xff]  }
  0x5e   : > { %997 = vmatprep.subr.bf16.mxu0 %v1101_v3  ;;  %689 = vmatprep.subr.bf16.mxu1 %v1112_v13  ;;  %v1126_v22 = vld [vmem:[%s1499_s29 + $0x20] ss:$8 sps:$4 sm:$0xff]   ;;  %v1127_v23 = vld [vmem:[%s1499_s29 + $0x14] ss:$8 sps:$4 sm:$0xff]   ;;  %v1129_v24 = vld [vmem:[%s1499_s29 + $0x10] ss:$8 sps:$4 sm:$0xff]  }
  0x5f   : > { %v1130_v25 = vld [vmem:[%s1499_s29 + $0x4] ss:$8 sps:$4 sm:$0xff]   ;;  %v1132_v26 = vld [vmem:[%s1499_s29] ss:$8 sps:$4 sm:$0xff]   ;;  %v552_v62 = vld [vmem:[%s369_s21] sm:$0x1] }
  0x60   : > { %v1534_v63 = vsub.s32 0, %v1526_v61  ;;  %v554_v2 = vld [vmem:[%s372_s28] sm:$0x1] }
  0x61   : > { %998 = vmatpush3.bf16.msra.mxu0 %v1101_v3  ;;  %690 = vmatpush1.bf16.msra.mxu1 %v1114_v14 }
  0x62   : > { %999 = vmatprep.subr.bf16.mxu0 %v1102_v4  ;;  %691 = vmatprep.subr.bf16.mxu1 %v1115_v15 }
  0x65   : > { %1000 = vmatpush3.bf16.msra.mxu0 %v1102_v4  ;;  %692 = vmatpush1.bf16.msra.mxu1 %v1117_v16 }
  0x66   : > { %1001 = vmatprep.subr.bf16.mxu0 %v1103_v6  ;;  %693 = vmatprep.subr.bf16.mxu1 %v1118_v17 }
  0x69   : > { %1002 = vmatpush3.bf16.msra.mxu0 %v1103_v6  ;;  %694 = vmatpush1.bf16.msra.mxu1 %v1120_v18 }
  0x6a   : > { %1003 = vmatprep.subr.bf16.mxu0 %v1104_v7  ;;  %695 = vmatprep.subr.bf16.mxu1 %v1121_v19 }
  0x6d   : > { %1004 = vmatpush3.bf16.msra.mxu0 %v1104_v7  ;;  %696 = vmatpush1.bf16.msra.mxu1 %v1123_v20 }
  0x6e   : > { %1005 = vmatprep.subr.bf16.mxu0 %v1105_v8  ;;  %697 = vmatprep.subr.bf16.mxu1 %v1124_v21  ;;  %v581_v21 = vld [vmem:[#allocation2 + $0x30] sm:$0xff] }
  0x71   : > { %1006 = vmatpush3.bf16.msra.mxu0 %v1105_v8  ;;  %698 = vmatpush1.bf16.msra.mxu1 %v1126_v22 }
  0x72   : > { %1007 = vmatprep.subr.bf16.mxu0 %v1106_v9  ;;  %699 = vmatprep.subr.bf16.mxu1 %v1127_v23  ;;  %v582_v23 = vld [vmem:[#allocation2] sm:$0xff] }
  0x75   : > { %1008 = vmatpush3.bf16.msra.mxu0 %v1106_v9  ;;  %700 = vmatpush1.bf16.msra.mxu1 %v1129_v24 }
  0x76   : > { %701 = vmatprep.subr.bf16.mxu1 %v1130_v25 }
  0x78   : > { %1010 = vmatmul.mubr.bf16.vlgmr.msra.gmra.mxu0 %v1108_v10 }
  0x79   : > { %702 = vmatpush1.bf16.msra.mxu1 %v1132_v26  ;;  %v583_v26 = vld [vmem:[#allocation2 + $0x18] sm:$0xff] }
 0x138   : > { %v1011_v28 = vpop.f32.mrf.mxu0 }
 0x139   : > { %v535_v35 = vmul.f32 %v1011_v28, %v1011_v28 }
 0x13a   : > { %v508_v29 = vpop.f32.mrf.mxu0 }
 0x13b   : > { %v533_v32 = vmul.f32 %v508_v29, %v508_v29 }
 0x13c   : > { %v1012_v30 = vpop.f32.mrf.mxu0 }
 0x13d   : > { %v536_v38 = vmul.f32 %v1012_v30, %v1012_v30 }
 0x13e   : > { %v511_v31 = vpop.f32.mrf.mxu0 }
 0x13f   : > { %v523_v33 = vadd.f32 %v511_v31, %v508_v29  ;;  %v534_v34 = vmul.f32 %v511_v31, %v511_v31 }
 0x141   : > { %v524_v36 = vadd.f32 %v1011_v28, %v523_v33  ;;  %v537_v37 = vadd.f32 %v534_v34, %v533_v32  ;;  %v585_v33 = vld [vmem:[#allocation2 + $0x8] sm:$0xff] }
 0x143   : > { %v525_v39 = vadd.f32 %v1012_v30, %v524_v36  ;;  %v538_v40 = vadd.f32 %v537_v37, %v535_v35  ;;  %v586_v35 = vld [vmem:[#allocation2 + $0x20] sm:$0xff] }
 0x145   : > { %v526_v41 = vrot.slane %v525_v39, 4  ;;  %v539_v42 = vadd.f32 %v538_v40, %v536_v38  ;;  %v587_v38 = vld [vmem:[#allocation2 + $0x28] sm:$0xff] }
 0x147   : > { %v527_v43 = vadd.f32 %v526_v41, %v525_v39  ;;  %v540_v44 = vrot.slane %v539_v42, 4  ;;  %v588_v41 = vld [vmem:[#allocation2 + $0x38] sm:$0xff] }
 0x149   : > { %v528_v45 = vrot.slane %v527_v43, 2  ;;  %v541_v46 = vadd.f32 %v540_v44, %v539_v42 }
 0x14b   : > { %v529_v47 = vadd.f32 %v528_v45, %v527_v43  ;;  %v542_v48 = vrot.slane %v541_v46, 2 }
 0x14d   : > { %v530_v49 = vrot.slane %v529_v47, 1  ;;  %v543_v50 = vadd.f32 %v542_v48, %v541_v46 }
 0x14f   : > { %v531_v51 = vadd.f32 %v530_v49, %v529_v47  ;;  %v544_v52 = vrot.slane %v543_v50, 1 }
 0x151   : > { %v532_v53 = vmul.f32 0.03125, %v531_v51  ;;  %v545_v54 = vadd.f32 %v544_v52, %v543_v50 }
 0x153   : > { %v546_v55 = vmul.f32 0.03125, %v545_v54  ;;  %v547_v56 = vmul.f32 %v532_v53, %v532_v53 }
 0x155   : > { %v548_v57 = vsub.f32 %v546_v55, %v547_v56 }
 0x157   : > { %v549_v58 = vmax.f32 %v548_v57, 0.0 }
 0x159   : > { %v550_v59 = vadd.f32 1e-05, %v549_v58 }
 0x15b   : > { %1133 = vrsqrt.f32 %v550_v59 }
 0x168   : > { %v1134_v0 = vpop.eup %1133 }
 0x169   : > { %v553_v1 = vmul.f32 %v1134_v0, %v552_v62 }
 0x16b   : > { %v555_v3 = vmul.f32 %v553_v1, %v532_v53  ;;  %v561_v4 = vrot.slane %v553_v1, %v1534_v63 }
 0x16d   : > { %v556_v5 = vsub.f32 %v554_v2, %v555_v3  ;;  %v564_v6 = vmul.f32 %v561_v4, %v511_v31  ;;  %v563_v8 = vmul.f32 %v561_v4, %v508_v29  ;;  %v565_v13 = vmul.f32 %v1011_v28, %v561_v4  ;;  %v584_v28 = vld [vmem:[#allocation2 + $0x10] sm:$0xff] }
 0x16e   : > { %v566_v14 = vmul.f32 %v1012_v30, %v561_v4 }
 0x16f   : > { %v571_v7 = vrot.slane %v556_v5, %v1534_v63 }
 0x171   : > { %v574_v9 = vadd.f32 %v571_v7, %v564_v6  ;;  %v573_v10 = vadd.f32 %v571_v7, %v563_v8  ;;  %v575_v16 = vadd.f32 %v571_v7, %v565_v13  ;;  %v576_v17 = vadd.f32 %v571_v7, %v566_v14 }
 0x173   : > { %v578_v11 = vmax.f32 %v574_v9, 0.0  ;;  %v577_v12 = vmax.f32 %v573_v10, 0.0  ;;  %v579_v18 = vmax.f32 %v575_v16, 0.0  ;;  %v580_v19 = vmax.f32 %v576_v17, 0.0 }
 0x175   : > { %v589_v15 = vpack.c.bf16 %v578_v11, %v577_v12  ;;  %v590_v20 = vpack.c.bf16 %v580_v19, %v579_v18 }
 0x177   : > { %720 = vmatmul.mubr.bf16.vlgmr.msra.gmra.mxu1 %v589_v15 }
 0x178   : > { %729 = vmatprep.mubr.bf16.mxu1 %v1309_v27 }
 0x17f   : > { %730 = vmatmul.mubr.bf16.gmra.mxu1 %v590_v20 }
 0x237   : > { %v721_v22 = vpop.f32.mrf.mxu1 }
 0x238   : > { %v740_v24 = vadd.f32 %v721_v22, %v581_v21 }
 0x239   : > { %v723_v25 = vpop.f32.mrf.mxu1 }
 0x23a   : > { %748 = vst [vmem:[#allocation2 + $0x30] sm:$0xff] %v740_v24  ;;  %v741_v29 = vadd.f32 %v723_v25, %v582_v23 }
 0x23b   : > { %v725_v31 = vpop.f32.mrf.mxu1 }
 0x23c   : > { %749 = vst [vmem:[#allocation2] sm:$0xff] %v741_v29  ;;  %v742_v30 = vadd.f32 %v725_v31, %v583_v26 }
 0x23d   : > { %v727_v32 = vpop.f32.mrf.mxu1 }
 0x23e   : > { %750 = vst [vmem:[#allocation2 + $0x18] sm:$0xff] %v742_v30  ;;  %v743_v27 = vadd.f32 %v727_v32, %v584_v28 }
 0x23f   : > { %v731_v34 = vpop.f32.mrf.mxu1 }
 0x240   : > { %751 = vst [vmem:[#allocation2 + $0x10] sm:$0xff] %v743_v27  ;;  %v744_v36 = vadd.f32 %v731_v34, %v585_v33 }
 0x241   : > { %v733_v37 = vpop.f32.mrf.mxu1 }
 0x242   : > { %752 = vst [vmem:[#allocation2 + $0x8] sm:$0xff] %v744_v36  ;;  %v745_v39 = vadd.f32 %v733_v37, %v586_v35 }
 0x243   : > { %v735_v40 = vpop.f32.mrf.mxu1 }
 0x244   : > { %753 = vst [vmem:[#allocation2 + $0x20] sm:$0xff] %v745_v39  ;;  %v746_v42 = vadd.f32 %v735_v40, %v587_v38  ;;  %759 = sbr.rel (%p976_p5) target bundleno = 595 (0x253), region = 64 }
 0x245   : > { %v737_v43 = vpop.f32.mrf.mxu1 }
 0x246   : > { %754 = vst [vmem:[#allocation2 + $0x28] sm:$0xff] %v746_v42  ;;  %v747_v44 = vadd.f32 %v737_v43, %v588_v41 }
 0x248   : > { %755 = vst [vmem:[#allocation2 + $0x38] sm:$0xff] %v747_v44 }
 0x249   : > { %v760_v45 = vld [vmem:[#allocation2 + $0x30] sm:$0xff]  ;;  %v768_v46 = vld [vmem:[%s1584_s5] sm:$0x3]  ;;  %v776_v48 = vsub.s32 1, %v1526_v61  ;;  %v762_v50 = vld [vmem:[#allocation2 + $0x18] sm:$0xff] }
 0x24a   : > { %v761_v47 = vld [vmem:[#allocation2] sm:$0xff]  ;;  %v773_v49 = vrot.slane %v768_v46, %v1534_v63  ;;  %v763_v51 = vld [vmem:[#allocation2 + $0x10] sm:$0xff]  ;;  %v764_v52 = vld [vmem:[#allocation2 + $0x8] sm:$0xff] }
 0x24b   : > { %v777_v53 = vrot.slane %v768_v46, %v776_v48  ;;  %v765_v54 = vld [vmem:[#allocation2 + $0x20] sm:$0xff] }
 0x24c   : > { %v780_v57 = vadd.f32 %v773_v49, %v760_v45  ;;  %v782_v58 = vadd.f32 %v773_v49, %v762_v50  ;;  %v784_v59 = vadd.f32 %v773_v49, %v764_v52 }
 0x24d   : > { %v766_v55 = vld [vmem:[#allocation2 + $0x28] sm:$0xff]  ;;  %v781_v62 = vadd.f32 %v777_v53, %v761_v47  ;;  %v783_v0 = vadd.f32 %v777_v53, %v763_v51  ;;  %v785_v1 = vadd.f32 %v777_v53, %v765_v54 }
 0x24e   : > { %v786_v60 = vadd.f32 %v773_v49, %v766_v55  ;;  %788 = vst [vmem:[#allocation9] sm:$0xff] %v780_v57  ;;  %790 = vst [vmem:[#allocation9 + $0x10] sm:$0xff] %v782_v58 }
 0x24f   : > { %v767_v56 = vld [vmem:[#allocation2 + $0x38] sm:$0xff]  ;;  %792 = vst [vmem:[#allocation9 + $0x20] sm:$0xff] %v784_v59  ;;  %789 = vst [vmem:[#allocation9 + $0x8] sm:$0xff] %v781_v62 }
 0x250   : > { %v787_v2 = vadd.f32 %v777_v53, %v767_v56  ;;  %794 = vst [vmem:[#allocation9 + $0x30] sm:$0xff] %v786_v60  ;;  %791 = vst [vmem:[#allocation9 + $0x18] sm:$0xff] %v783_v0 }
 0x251   : > { %793 = vst [vmem:[#allocation9 + $0x28] sm:$0xff] %v785_v1 }
 0x252   : > { %795 = vst [vmem:[#allocation9 + $0x38] sm:$0xff] %v787_v2 }
 0x253 PF: > { %p1039_p8 = scmp.eq.s32.totalorder %s1423_s11, 1  ;;  %s1310_s24 = smov [#allocation9]  }
 0x254   : > { %s805_s16 = sshll.u32 %s1310_s24, 4  ;;  %s806_s16 = int_to_ptr.vmem [resolvable:$true] %s805_s16 }
 0x255   : > { %s1217_s18 = scalar_lea.vmem %s806_s16, 1024  ;;  %p1224_p11 = scmp.lt.s32.totalorder %s806_s16, %s806_s16 }
 0x256   : > { %p1218_p10 = scmp.ne.s32.totalorder %s806_s16, %s1217_s18  ;;  %p1225_p12 = scmp.lt.s32.totalorder %s1217_s18, %s1217_s18 }
 0x258   : > { %p1219_p4 = pnand %p1218_p10, %p1039_p8  ;;  %p1226_p13 = por %p1225_p12, %p1224_p11 }
 0x25a   : > { %p1220_p9 = pneg %p1219_p4 }
 0x25c   : > { %p1227_p7 = pnand %p1226_p13, %p1220_p9 }
 0x25e   : > { %1230 = shalt.err (!%p1227_p7)
}
 0x25f   : > { %s1311_s30 = smov 256   ;;  %s1312_s13 = smov 16  }
 0x260   : > { %1022 = dma.vmem_to_hbm [thread:$0]  (%p1039_p8), %s806_s16, 1024, %s1585_s6, [#allocation5], %s1311_s30, %s1311_s30, %s1312_s13  }
 0x261   : > { %1274 = dma.done.wait (%p1039_p8), [#allocation5], 1024  }
 0x262   : > { %1276 = vsyncadd (%p1039_p8), [#allocation5], 4294966272 }
 0x263 PF: > { %s21_s26 = sadd.s32 1, %s1299_s26   ;;  %s1596_s21 = smov %s1283_s22 }
 0x264   : > { %p18_p0 = scmp.ge.s32.totalorder %s21_s26, 4   ;;  %s1597_s22 = smov %s1287_s23 }
 0x265   : > { %s1598_s23 = smov %s1395_s9  ;;  %s1599_s24 = smov %s1295_s25 }
 0x266   : > { %s1600_s25 = smov %s1602_s27  ;;  %20 = sbr.rel (!%p18_p0) target bundleno = 6 (0x6), region = 115 }
 0x26b   :  { %821 = vsyncpa [#allocation4], 1 }
 0x26c   :  { %823 = vsyncpa [#allocation4 + $0x1], 1 }
 0x26d   :  { %824 = vsyncpa [#allocation7], 1 }
 0x26e   :  { %826 = vsyncpa [#allocation7 + $0x1], 1 }
 0x26f   :  { %827 = vsyncpa [#allocation5], 1 }
 0x270   :  { %829 = vsyncpa [#allocation5 + $0x1], 1 }

</bundles_post_ra>
